<compile_context>
chip_gen: v6e
topology: v6e:2x2x1
jax: 0.10.0
libtpu: 0.0.40
codegen_flags: <defaults>
</compile_context>

<pallas_src>
import functools

import jax
import jax.numpy as jnp
from jax import lax
from jax.experimental import pallas as pl
from jax.experimental.pallas import tpu as pltpu
import numpy as np


def lstm_tagger_kernel(sent_ref, emb_ref, w_ih_ref, b_ref, w_hh_ref,
                       w_tag_ref, b_tag_ref, out_ref, h_hist, *, num_tags):
    S, T_PAD = out_ref.shape
    G = w_hh_ref.shape[0]            # packed gate width = 4H
    H = G // 4
    V, E = emb_ref.shape
    f32, bf16 = jnp.float32, jnp.bfloat16

    # ---- One-hot embedding lookup + hoisted input projection (MXU) ---------
    # Replaces the serialized per-token dynamic-row gather with two small
    # matmuls that are fully off the recurrent critical path.  Out-of-range
    # ids produce an all-zero one-hot row (zero embedding) instead of an OOB
    # VMEM read.
    ids = sent_ref[...]                                              # (S, 1) i32
    onehot = (lax.broadcasted_iota(jnp.int32, (S, V), 1) == ids).astype(bf16)
    x = jnp.dot(onehot, emb_ref[...].astype(bf16),
                preferred_element_type=f32)                          # (S, E)
    xw = jnp.dot(x.astype(bf16), w_ih_ref[...].astype(bf16),
                 preferred_element_type=f32) + b_ref[...]            # (S, 4H)

    # Only rows [3H, 4H) of w_hh_ref are non-zero (set up by the wrapper), so
    # the packed hidden vreg can be fed to the MXU without extracting h.
    w_hh = w_hh_ref[...].astype(bf16)                                # (4H, 4H)

    # Lane mask for the `g` gate segment (lanes [2H, 3H)).
    lane = lax.broadcasted_iota(jnp.int32, (1, G), 1)
    is_g = (lane >= 2 * H) & (lane < 3 * H)

    # Packed recurrent state: h lives in lanes [3H,4H) of hp, c in [H,2H) of cp.
    # Other lanes carry bounded don't-care values that only ever multiply zero
    # weight rows.
    hp = jnp.zeros((1, G), f32)
    cp = jnp.zeros((1, G), f32)

    # Fully unrolled: S is small and static.
    # TODO(synk): switch to lax.fori_loop(..., unroll=True) if S grows past ~32.
    for t in range(S):
        gates = xw[t:t + 1, :] + jnp.dot(hp.astype(bf16), w_hh,
                                         preferred_element_type=f32)  # (1,4H)
        # Full-width activations, packed layout [ i | f | g | o ].
        act = jnp.where(is_g, jnp.tanh(gates), jax.nn.sigmoid(gates))
        # i*g lands in segment 0 (and 2); f*c lands in segment 1.
        ig = act * pltpu.roll(act, shift=2 * H, axis=1)
        fc = act * cp
        # c_new = f*c + i*g, aligned to segment 1 (the f / c slot).
        cp = pltpu.roll(ig, shift=H, axis=1) + fc
        # h_new = o * tanh(c_new), aligned to segment 3 (the o / h slot).
        hp = act * pltpu.roll(jnp.tanh(cp), shift=2 * H, axis=1)
        # Lane-dense, unmasked (1, 128) store, off the serial read path.
        h_hist[pl.ds(t, 1), :] = hp

    # ---- Hoisted tag head + masked log_softmax, single lane-dense store ----
    # w_tag_ref is zero outside rows [3H,4H) and cols [0,T), so packed garbage
    # lanes of h_hist contribute nothing.
    logits = (jnp.dot(h_hist[...].astype(bf16), w_tag_ref[...].astype(bf16),
                      preferred_element_type=f32) + b_tag_ref[...])  # (S,T_PAD)
    tag_lane = lax.broadcasted_iota(jnp.int32, (S, T_PAD), 1)
    logits = jnp.where(tag_lane < num_tags, logits, -1e30)
    m = jnp.max(logits, axis=-1, keepdims=True)
    z = logits - m
    lse = jnp.log(jnp.sum(jnp.exp(z), axis=-1, keepdims=True))
    out_ref[...] = (z - lse).astype(out_ref.dtype)


def lstm_tagger_forward(sentence, emb_table, w_ih, w_hh, bias, w_tag, b_tag):
    S = sentence.shape[0]
    H = w_hh.shape[0]
    G = 4 * H
    T = w_tag.shape[-1]
    T_PAD = pl.cdiv(T, 128) * 128

    # Layout plumbing (in a real model this would be done once at init):
    #  * zero-row-pad W_hh to (4H,4H) so the packed hidden vreg feeds the MXU,
    #  * zero-pad the tag head to a lane-dense (4H, T_PAD) / (1, T_PAD) slab.
    w_hh_pad = jnp.zeros((G, G), jnp.float32).at[3 * H:, :].set(w_hh)
    w_tag_pad = jnp.zeros((G, T_PAD), jnp.float32).at[3 * H:, :T].set(w_tag)
    b_tag_pad = jnp.zeros((1, T_PAD), jnp.float32).at[:, :T].set(b_tag)
    sent2d = sentence.reshape(S, 1).astype(jnp.int32)

    vmem = lambda: pl.BlockSpec(memory_space=pltpu.MemorySpace.VMEM)
    out_pad = pl.pallas_call(
        functools.partial(lstm_tagger_kernel, num_tags=T),
        out_shape=jax.ShapeDtypeStruct((S, T_PAD), jnp.float32),
        in_specs=[vmem() for _ in range(7)],
        out_specs=vmem(),
        scratch_shapes=[
            pltpu.VMEM((S, G), jnp.float32),   # packed hidden-state history
        ],
    )(sent2d, emb_table, w_ih, bias, w_hh_pad, w_tag_pad, b_tag_pad)
    return out_pad[:, :T]


def reference_forward(sentence, emb_table, w_ih, w_hh, bias, w_tag, b_tag):
    """Pure-JAX f32 reference matching PyTorch LSTMTagger semantics."""
    H = w_hh.shape[0]
    embeds = emb_table[sentence]                          # (S, E)

    def step(carry, x):
        h, c = carry
        gates = x[None, :] @ w_ih + h @ w_hh + bias
        i_g = jax.nn.sigmoid(gates[:, 0 * H:1 * H])
        f_g = jax.nn.sigmoid(gates[:, 1 * H:2 * H])
        g_g = jnp.tanh(gates[:, 2 * H:3 * H])
        o_g = jax.nn.sigmoid(gates[:, 3 * H:4 * H])
        c = f_g * c + i_g * g_g
        h = o_g * jnp.tanh(c)
        return (h, c), h[0]

    h0 = jnp.zeros((1, H), jnp.float32)
    c0 = jnp.zeros((1, H), jnp.float32)
    _, hs = lax.scan(step, (h0, c0), embeds)              # (S, H)
    logits = hs @ w_tag + b_tag                           # (S, T)
    return jax.nn.log_softmax(logits, axis=1)


if __name__ == "__main__":
    EMBEDDING_DIM = 16
    HIDDEN_DIM = 32          # 4H = 128 -> packed gates fill one vreg exactly
    VOCAB_SIZE = 20
    TAGSET_SIZE = 8
    SEQ_LEN = 8

    key = jax.random.PRNGKey(0)
    k = jax.random.split(key, 8)

    scale_lstm = 1.0 / np.sqrt(HIDDEN_DIM)
    scale_lin = 1.0 / np.sqrt(HIDDEN_DIM)

    emb_table = jax.random.normal(k[0], (VOCAB_SIZE, EMBEDDING_DIM), jnp.float32)
    w_ih = jax.random.uniform(k[1], (EMBEDDING_DIM, 4 * HIDDEN_DIM), jnp.float32,
                              -scale_lstm, scale_lstm)
    w_hh = jax.random.uniform(k[2], (HIDDEN_DIM, 4 * HIDDEN_DIM), jnp.float32,
                              -scale_lstm, scale_lstm)
    b_ih = jax.random.uniform(k[3], (4 * HIDDEN_DIM,), jnp.float32,
                              -scale_lstm, scale_lstm)
    b_hh = jax.random.uniform(k[4], (4 * HIDDEN_DIM,), jnp.float32,
                              -scale_lstm, scale_lstm)
    bias = (b_ih + b_hh)[None, :]                         # (1, 4H)
    w_tag = jax.random.uniform(k[5], (HIDDEN_DIM, TAGSET_SIZE), jnp.float32,
                               -scale_lin, scale_lin)
    b_tag = jax.random.uniform(k[6], (1, TAGSET_SIZE), jnp.float32,
                               -scale_lin, scale_lin)

    sentence = jax.random.randint(k[7], (SEQ_LEN,), 0, VOCAB_SIZE, jnp.int32)

    tag_scores = lstm_tagger_forward(sentence, emb_table, w_ih, w_hh, bias,
                                     w_tag, b_tag)
    tag_scores = jax.block_until_ready(tag_scores)

    ref = reference_forward(sentence, emb_table, w_ih, w_hh, bias, w_tag, b_tag)
    # Tolerance relaxed vs. the pure-f32 version because MXU operands are bf16.
    np.testing.assert_allclose(np.asarray(tag_scores), np.asarray(ref),
                               rtol=2e-2, atol=2e-2)

    print("KERNEL_OK")
</pallas_src>

<mosaic_0001>
module attributes {stable_mosaic.version = 11 : i64} {
  func.func @lstm_tagger_kernel(%arg0: memref<8x1xi32, #tpu.memory_space<vmem>>, %arg1: memref<20x16xf32, #tpu.memory_space<vmem>>, %arg2: memref<16x128xf32, #tpu.memory_space<vmem>>, %arg3: memref<1x128xf32, #tpu.memory_space<vmem>>, %arg4: memref<128x128xf32, #tpu.memory_space<vmem>>, %arg5: memref<128x128xf32, #tpu.memory_space<vmem>>, %arg6: memref<1x128xf32, #tpu.memory_space<vmem>>, %arg7: memref<8x128xf32, #tpu.memory_space<vmem>>, %arg8: memref<8x128xf32, #tpu.memory_space<vmem>>) attributes {dimension_semantics = [], scalar_prefetch = 0 : i64, scratch_operands = 1 : i64, tpu.core_type = #tpu.core_type<tc>} {
    %c0 = arith.constant 0 : index
    %c0_0 = arith.constant 0 : index
    %0 = vector.load %arg0[%c0, %c0_0] : memref<8x1xi32, #tpu.memory_space<vmem>>, vector<8x1xi32>
    %1 = tpu.iota {dimensions = array<i32: 1>} : vector<8x20xi32>
    %2 = vector.broadcast %0 : vector<8x1xi32> to vector<8x20xi32>
    %3 = arith.cmpi eq, %1, %2 : vector<8x20xi32>
    %4 = arith.extui %3 : vector<8x20xi1> to vector<8x20xi32>
    %5 = arith.sitofp %4 : vector<8x20xi32> to vector<8x20xf32>
    %6 = arith.truncf %5 : vector<8x20xf32> to vector<8x20xbf16>
    %c0_1 = arith.constant 0 : index
    %c0_2 = arith.constant 0 : index
    %7 = vector.load %arg1[%c0_1, %c0_2] : memref<20x16xf32, #tpu.memory_space<vmem>>, vector<20x16xf32>
    %8 = arith.truncf %7 : vector<20x16xf32> to vector<20x16xbf16>
    %cst = arith.constant dense<0.000000e+00> : vector<8x16xf32>
    %9 = tpu.matmul %6, %8, %cst {dimension_numbers = #tpu.dot_dimension_numbers<[1], [0], [0], [1], [0, 0, 1, 1], [], []>} : vector<8x20xbf16>, vector<20x16xbf16>, vector<8x16xf32> -> vector<8x16xf32>
    %10 = arith.truncf %9 : vector<8x16xf32> to vector<8x16xbf16>
    %c0_3 = arith.constant 0 : index
    %c0_4 = arith.constant 0 : index
    %11 = vector.load %arg2[%c0_3, %c0_4] : memref<16x128xf32, #tpu.memory_space<vmem>>, vector<16x128xf32>
    %12 = arith.truncf %11 : vector<16x128xf32> to vector<16x128xbf16>
    %cst_5 = arith.constant dense<0.000000e+00> : vector<8x128xf32>
    %13 = tpu.matmul %10, %12, %cst_5 {dimension_numbers = #tpu.dot_dimension_numbers<[1], [0], [0], [1], [0, 0, 1, 1], [], []>} : vector<8x16xbf16>, vector<16x128xbf16>, vector<8x128xf32> -> vector<8x128xf32>
    %c0_6 = arith.constant 0 : index
    %c0_7 = arith.constant 0 : index
    %14 = vector.load %arg3[%c0_6, %c0_7] : memref<1x128xf32, #tpu.memory_space<vmem>>, vector<1x128xf32>
    %15 = vector.broadcast %14 : vector<1x128xf32> to vector<8x128xf32>
    %16 = arith.addf %13, %15 : vector<8x128xf32>
    %c0_8 = arith.constant 0 : index
    %c0_9 = arith.constant 0 : index
    %17 = vector.load %arg4[%c0_8, %c0_9] : memref<128x128xf32, #tpu.memory_space<vmem>>, vector<128x128xf32>
    %18 = arith.truncf %17 : vector<128x128xf32> to vector<128x128xbf16>
    %19 = tpu.iota {dimensions = array<i32: 1>} : vector<1x128xi32>
    %c64_i32 = arith.constant 64 : i32
    %20 = vector.broadcast %c64_i32 : i32 to vector<1x128xi32>
    %21 = arith.cmpi sge, %19, %20 : vector<1x128xi32>
    %c96_i32 = arith.constant 96 : i32
    %22 = vector.broadcast %c96_i32 : i32 to vector<1x128xi32>
    %23 = arith.cmpi slt, %19, %22 : vector<1x128xi32>
    %24 = arith.andi %21, %23 : vector<1x128xi1>
    %cst_10 = arith.constant 0.000000e+00 : f32
    %25 = vector.broadcast %cst_10 : f32 to vector<1x128xf32>
    %cst_11 = arith.constant 0.000000e+00 : f32
    %26 = vector.broadcast %cst_11 : f32 to vector<1x128xf32>
    %27 = vector.extract_strided_slice %16 {offsets = [0, 0], sizes = [1, 128], strides = [1, 1]} : vector<8x128xf32> to vector<1x128xf32>
    %28 = arith.truncf %25 : vector<1x128xf32> to vector<1x128xbf16>
    %cst_12 = arith.constant dense<0.000000e+00> : vector<1x128xf32>
    %29 = tpu.matmul %28, %18, %cst_12 {dimension_numbers = #tpu.dot_dimension_numbers<[1], [0], [0], [1], [0, 0, 1, 1], [], []>} : vector<1x128xbf16>, vector<128x128xbf16>, vector<1x128xf32> -> vector<1x128xf32>
    %30 = arith.addf %27, %29 : vector<1x128xf32>
    %31 = math.tanh %30 : vector<1x128xf32>
    %32 = arith.negf %30 : vector<1x128xf32>
    %33 = math.exp %32 : vector<1x128xf32>
    %cst_13 = arith.constant 1.000000e+00 : f32
    %34 = vector.broadcast %cst_13 : f32 to vector<1x128xf32>
    %35 = arith.addf %34, %33 : vector<1x128xf32>
    %36 = arith.divf %34, %35 : vector<1x128xf32>
    %37 = arith.select %24, %31, %36 : vector<1x128xi1>, vector<1x128xf32>
    %c64_i32_14 = arith.constant 64 : i32
    %38 = tpu.dynamic_rotate %37 by %c64_i32_14 dim 1 : vector<1x128xf32>, i32 -> vector<1x128xf32>
    %39 = arith.mulf %37, %38 : vector<1x128xf32>
    %40 = arith.mulf %37, %26 : vector<1x128xf32>
    %c32_i32 = arith.constant 32 : i32
    %41 = tpu.dynamic_rotate %39 by %c32_i32 dim 1 : vector<1x128xf32>, i32 -> vector<1x128xf32>
    %42 = arith.addf %41, %40 : vector<1x128xf32>
    %43 = math.tanh %42 : vector<1x128xf32>
    %c64_i32_15 = arith.constant 64 : i32
    %44 = tpu.dynamic_rotate %43 by %c64_i32_15 dim 1 : vector<1x128xf32>, i32 -> vector<1x128xf32>
    %45 = arith.mulf %37, %44 : vector<1x128xf32>
    %c0_16 = arith.constant 0 : index
    %c0_17 = arith.constant 0 : index
    %46 = vector.load %arg8[%c0_16, %c0_17] : memref<8x128xf32, #tpu.memory_space<vmem>>, vector<1x128xf32>
    tpu.vector_store %arg8[%c0_16, %c0_17], %45 {strides = array<i32>} : memref<8x128xf32, #tpu.memory_space<vmem>>, vector<1x128xf32>,
    %47 = vector.extract_strided_slice %16 {offsets = [1, 0], sizes = [1, 128], strides = [1, 1]} : vector<8x128xf32> to vector<1x128xf32>
    %48 = arith.truncf %45 : vector<1x128xf32> to vector<1x128xbf16>
    %cst_18 = arith.constant dense<0.000000e+00> : vector<1x128xf32>
    %49 = tpu.matmul %48, %18, %cst_18 {dimension_numbers = #tpu.dot_dimension_numbers<[1], [0], [0], [1], [0, 0, 1, 1], [], []>} : vector<1x128xbf16>, vector<128x128xbf16>, vector<1x128xf32> -> vector<1x128xf32>
    %50 = arith.addf %47, %49 : vector<1x128xf32>
    %51 = math.tanh %50 : vector<1x128xf32>
    %52 = arith.negf %50 : vector<1x128xf32>
    %53 = math.exp %52 : vector<1x128xf32>
    %cst_19 = arith.constant 1.000000e+00 : f32
    %54 = vector.broadcast %cst_19 : f32 to vector<1x128xf32>
    %55 = arith.addf %54, %53 : vector<1x128xf32>
    %56 = arith.divf %54, %55 : vector<1x128xf32>
    %57 = arith.select %24, %51, %56 : vector<1x128xi1>, vector<1x128xf32>
    %c64_i32_20 = arith.constant 64 : i32
    %58 = tpu.dynamic_rotate %57 by %c64_i32_20 dim 1 : vector<1x128xf32>, i32 -> vector<1x128xf32>
    %59 = arith.mulf %57, %58 : vector<1x128xf32>
    %60 = arith.mulf %57, %42 : vector<1x128xf32>
    %c32_i32_21 = arith.constant 32 : i32
    %61 = tpu.dynamic_rotate %59 by %c32_i32_21 dim 1 : vector<1x128xf32>, i32 -> vector<1x128xf32>
    %62 = arith.addf %61, %60 : vector<1x128xf32>
    %63 = math.tanh %62 : vector<1x128xf32>
    %c64_i32_22 = arith.constant 64 : i32
    %64 = tpu.dynamic_rotate %63 by %c64_i32_22 dim 1 : vector<1x128xf32>, i32 -> vector<1x128xf32>
    %65 = arith.mulf %57, %64 : vector<1x128xf32>
    %c1 = arith.constant 1 : index
    %c0_23 = arith.constant 0 : index
    %66 = vector.load %arg8[%c1, %c0_23] : memref<8x128xf32, #tpu.memory_space<vmem>>, vector<1x128xf32>
    tpu.vector_store %arg8[%c1, %c0_23], %65 {strides = array<i32>} : memref<8x128xf32, #tpu.memory_space<vmem>>, vector<1x128xf32>,
    %67 = vector.extract_strided_slice %16 {offsets = [2, 0], sizes = [1, 128], strides = [1, 1]} : vector<8x128xf32> to vector<1x128xf32>
    %68 = arith.truncf %65 : vector<1x128xf32> to vector<1x128xbf16>
    %cst_24 = arith.constant dense<0.000000e+00> : vector<1x128xf32>
    %69 = tpu.matmul %68, %18, %cst_24 {dimension_numbers = #tpu.dot_dimension_numbers<[1], [0], [0], [1], [0, 0, 1, 1], [], []>} : vector<1x128xbf16>, vector<128x128xbf16>, vector<1x128xf32> -> vector<1x128xf32>
    %70 = arith.addf %67, %69 : vector<1x128xf32>
    %71 = math.tanh %70 : vector<1x128xf32>
    %72 = arith.negf %70 : vector<1x128xf32>
    %73 = math.exp %72 : vector<1x128xf32>
    %cst_25 = arith.constant 1.000000e+00 : f32
    %74 = vector.broadcast %cst_25 : f32 to vector<1x128xf32>
    %75 = arith.addf %74, %73 : vector<1x128xf32>
    %76 = arith.divf %74, %75 : vector<1x128xf32>
    %77 = arith.select %24, %71, %76 : vector<1x128xi1>, vector<1x128xf32>
    %c64_i32_26 = arith.constant 64 : i32
    %78 = tpu.dynamic_rotate %77 by %c64_i32_26 dim 1 : vector<1x128xf32>, i32 -> vector<1x128xf32>
    %79 = arith.mulf %77, %78 : vector<1x128xf32>
    %80 = arith.mulf %77, %62 : vector<1x128xf32>
    %c32_i32_27 = arith.constant 32 : i32
    %81 = tpu.dynamic_rotate %79 by %c32_i32_27 dim 1 : vector<1x128xf32>, i32 -> vector<1x128xf32>
    %82 = arith.addf %81, %80 : vector<1x128xf32>
    %83 = math.tanh %82 : vector<1x128xf32>
    %c64_i32_28 = arith.constant 64 : i32
    %84 = tpu.dynamic_rotate %83 by %c64_i32_28 dim 1 : vector<1x128xf32>, i32 -> vector<1x128xf32>
    %85 = arith.mulf %77, %84 : vector<1x128xf32>
    %c2 = arith.constant 2 : index
    %c0_29 = arith.constant 0 : index
    %86 = vector.load %arg8[%c2, %c0_29] : memref<8x128xf32, #tpu.memory_space<vmem>>, vector<1x128xf32>
    tpu.vector_store %arg8[%c2, %c0_29], %85 {strides = array<i32>} : memref<8x128xf32, #tpu.memory_space<vmem>>, vector<1x128xf32>,
    %87 = vector.extract_strided_slice %16 {offsets = [3, 0], sizes = [1, 128], strides = [1, 1]} : vector<8x128xf32> to vector<1x128xf32>
    %88 = arith.truncf %85 : vector<1x128xf32> to vector<1x128xbf16>
    %cst_30 = arith.constant dense<0.000000e+00> : vector<1x128xf32>
    %89 = tpu.matmul %88, %18, %cst_30 {dimension_numbers = #tpu.dot_dimension_numbers<[1], [0], [0], [1], [0, 0, 1, 1], [], []>} : vector<1x128xbf16>, vector<128x128xbf16>, vector<1x128xf32> -> vector<1x128xf32>
    %90 = arith.addf %87, %89 : vector<1x128xf32>
    %91 = math.tanh %90 : vector<1x128xf32>
    %92 = arith.negf %90 : vector<1x128xf32>
    %93 = math.exp %92 : vector<1x128xf32>
    %cst_31 = arith.constant 1.000000e+00 : f32
    %94 = vector.broadcast %cst_31 : f32 to vector<1x128xf32>
    %95 = arith.addf %94, %93 : vector<1x128xf32>
    %96 = arith.divf %94, %95 : vector<1x128xf32>
    %97 = arith.select %24, %91, %96 : vector<1x128xi1>, vector<1x128xf32>
    %c64_i32_32 = arith.constant 64 : i32
    %98 = tpu.dynamic_rotate %97 by %c64_i32_32 dim 1 : vector<1x128xf32>, i32 -> vector<1x128xf32>
    %99 = arith.mulf %97, %98 : vector<1x128xf32>
    %100 = arith.mulf %97, %82 : vector<1x128xf32>
    %c32_i32_33 = arith.constant 32 : i32
    %101 = tpu.dynamic_rotate %99 by %c32_i32_33 dim 1 : vector<1x128xf32>, i32 -> vector<1x128xf32>
    %102 = arith.addf %101, %100 : vector<1x128xf32>
    %103 = math.tanh %102 : vector<1x128xf32>
    %c64_i32_34 = arith.constant 64 : i32
    %104 = tpu.dynamic_rotate %103 by %c64_i32_34 dim 1 : vector<1x128xf32>, i32 -> vector<1x128xf32>
    %105 = arith.mulf %97, %104 : vector<1x128xf32>
    %c3 = arith.constant 3 : index
    %c0_35 = arith.constant 0 : index
    %106 = vector.load %arg8[%c3, %c0_35] : memref<8x128xf32, #tpu.memory_space<vmem>>, vector<1x128xf32>
    tpu.vector_store %arg8[%c3, %c0_35], %105 {strides = array<i32>} : memref<8x128xf32, #tpu.memory_space<vmem>>, vector<1x128xf32>,
    %107 = vector.extract_strided_slice %16 {offsets = [4, 0], sizes = [1, 128], strides = [1, 1]} : vector<8x128xf32> to vector<1x128xf32>
    %108 = arith.truncf %105 : vector<1x128xf32> to vector<1x128xbf16>
    %cst_36 = arith.constant dense<0.000000e+00> : vector<1x128xf32>
    %109 = tpu.matmul %108, %18, %cst_36 {dimension_numbers = #tpu.dot_dimension_numbers<[1], [0], [0], [1], [0, 0, 1, 1], [], []>} : vector<1x128xbf16>, vector<128x128xbf16>, vector<1x128xf32> -> vector<1x128xf32>
    %110 = arith.addf %107, %109 : vector<1x128xf32>
    %111 = math.tanh %110 : vector<1x128xf32>
    %112 = arith.negf %110 : vector<1x128xf32>
    %113 = math.exp %112 : vector<1x128xf32>
    %cst_37 = arith.constant 1.000000e+00 : f32
    %114 = vector.broadcast %cst_37 : f32 to vector<1x128xf32>
    %115 = arith.addf %114, %113 : vector<1x128xf32>
    %116 = arith.divf %114, %115 : vector<1x128xf32>
    %117 = arith.select %24, %111, %116 : vector<1x128xi1>, vector<1x128xf32>
    %c64_i32_38 = arith.constant 64 : i32
    %118 = tpu.dynamic_rotate %117 by %c64_i32_38 dim 1 : vector<1x128xf32>, i32 -> vector<1x128xf32>
    %119 = arith.mulf %117, %118 : vector<1x128xf32>
    %120 = arith.mulf %117, %102 : vector<1x128xf32>
    %c32_i32_39 = arith.constant 32 : i32
    %121 = tpu.dynamic_rotate %119 by %c32_i32_39 dim 1 : vector<1x128xf32>, i32 -> vector<1x128xf32>
    %122 = arith.addf %121, %120 : vector<1x128xf32>
    %123 = math.tanh %122 : vector<1x128xf32>
    %c64_i32_40 = arith.constant 64 : i32
    %124 = tpu.dynamic_rotate %123 by %c64_i32_40 dim 1 : vector<1x128xf32>, i32 -> vector<1x128xf32>
    %125 = arith.mulf %117, %124 : vector<1x128xf32>
    %c4 = arith.constant 4 : index
    %c0_41 = arith.constant 0 : index
    %126 = vector.load %arg8[%c4, %c0_41] : memref<8x128xf32, #tpu.memory_space<vmem>>, vector<1x128xf32>
    tpu.vector_store %arg8[%c4, %c0_41], %125 {strides = array<i32>} : memref<8x128xf32, #tpu.memory_space<vmem>>, vector<1x128xf32>,
    %127 = vector.extract_strided_slice %16 {offsets = [5, 0], sizes = [1, 128], strides = [1, 1]} : vector<8x128xf32> to vector<1x128xf32>
    %128 = arith.truncf %125 : vector<1x128xf32> to vector<1x128xbf16>
    %cst_42 = arith.constant dense<0.000000e+00> : vector<1x128xf32>
    %129 = tpu.matmul %128, %18, %cst_42 {dimension_numbers = #tpu.dot_dimension_numbers<[1], [0], [0], [1], [0, 0, 1, 1], [], []>} : vector<1x128xbf16>, vector<128x128xbf16>, vector<1x128xf32> -> vector<1x128xf32>
    %130 = arith.addf %127, %129 : vector<1x128xf32>
    %131 = math.tanh %130 : vector<1x128xf32>
    %132 = arith.negf %130 : vector<1x128xf32>
    %133 = math.exp %132 : vector<1x128xf32>
    %cst_43 = arith.constant 1.000000e+00 : f32
    %134 = vector.broadcast %cst_43 : f32 to vector<1x128xf32>
    %135 = arith.addf %134, %133 : vector<1x128xf32>
    %136 = arith.divf %134, %135 : vector<1x128xf32>
    %137 = arith.select %24, %131, %136 : vector<1x128xi1>, vector<1x128xf32>
    %c64_i32_44 = arith.constant 64 : i32
    %138 = tpu.dynamic_rotate %137 by %c64_i32_44 dim 1 : vector<1x128xf32>, i32 -> vector<1x128xf32>
    %139 = arith.mulf %137, %138 : vector<1x128xf32>
    %140 = arith.mulf %137, %122 : vector<1x128xf32>
    %c32_i32_45 = arith.constant 32 : i32
    %141 = tpu.dynamic_rotate %139 by %c32_i32_45 dim 1 : vector<1x128xf32>, i32 -> vector<1x128xf32>
    %142 = arith.addf %141, %140 : vector<1x128xf32>
    %143 = math.tanh %142 : vector<1x128xf32>
    %c64_i32_46 = arith.constant 64 : i32
    %144 = tpu.dynamic_rotate %143 by %c64_i32_46 dim 1 : vector<1x128xf32>, i32 -> vector<1x128xf32>
    %145 = arith.mulf %137, %144 : vector<1x128xf32>
    %c5 = arith.constant 5 : index
    %c0_47 = arith.constant 0 : index
    %146 = vector.load %arg8[%c5, %c0_47] : memref<8x128xf32, #tpu.memory_space<vmem>>, vector<1x128xf32>
    tpu.vector_store %arg8[%c5, %c0_47], %145 {strides = array<i32>} : memref<8x128xf32, #tpu.memory_space<vmem>>, vector<1x128xf32>,
    %147 = vector.extract_strided_slice %16 {offsets = [6, 0], sizes = [1, 128], strides = [1, 1]} : vector<8x128xf32> to vector<1x128xf32>
    %148 = arith.truncf %145 : vector<1x128xf32> to vector<1x128xbf16>
    %cst_48 = arith.constant dense<0.000000e+00> : vector<1x128xf32>
    %149 = tpu.matmul %148, %18, %cst_48 {dimension_numbers = #tpu.dot_dimension_numbers<[1], [0], [0], [1], [0, 0, 1, 1], [], []>} : vector<1x128xbf16>, vector<128x128xbf16>, vector<1x128xf32> -> vector<1x128xf32>
    %150 = arith.addf %147, %149 : vector<1x128xf32>
    %151 = math.tanh %150 : vector<1x128xf32>
    %152 = arith.negf %150 : vector<1x128xf32>
    %153 = math.exp %152 : vector<1x128xf32>
    %cst_49 = arith.constant 1.000000e+00 : f32
    %154 = vector.broadcast %cst_49 : f32 to vector<1x128xf32>
    %155 = arith.addf %154, %153 : vector<1x128xf32>
    %156 = arith.divf %154, %155 : vector<1x128xf32>
    %157 = arith.select %24, %151, %156 : vector<1x128xi1>, vector<1x128xf32>
    %c64_i32_50 = arith.constant 64 : i32
    %158 = tpu.dynamic_rotate %157 by %c64_i32_50 dim 1 : vector<1x128xf32>, i32 -> vector<1x128xf32>
    %159 = arith.mulf %157, %158 : vector<1x128xf32>
    %160 = arith.mulf %157, %142 : vector<1x128xf32>
    %c32_i32_51 = arith.constant 32 : i32
    %161 = tpu.dynamic_rotate %159 by %c32_i32_51 dim 1 : vector<1x128xf32>, i32 -> vector<1x128xf32>
    %162 = arith.addf %161, %160 : vector<1x128xf32>
    %163 = math.tanh %162 : vector<1x128xf32>
    %c64_i32_52 = arith.constant 64 : i32
    %164 = tpu.dynamic_rotate %163 by %c64_i32_52 dim 1 : vector<1x128xf32>, i32 -> vector<1x128xf32>
    %165 = arith.mulf %157, %164 : vector<1x128xf32>
    %c6 = arith.constant 6 : index
    %c0_53 = arith.constant 0 : index
    %166 = vector.load %arg8[%c6, %c0_53] : memref<8x128xf32, #tpu.memory_space<vmem>>, vector<1x128xf32>
    tpu.vector_store %arg8[%c6, %c0_53], %165 {strides = array<i32>} : memref<8x128xf32, #tpu.memory_space<vmem>>, vector<1x128xf32>,
    %167 = vector.extract_strided_slice %16 {offsets = [7, 0], sizes = [1, 128], strides = [1, 1]} : vector<8x128xf32> to vector<1x128xf32>
    %168 = arith.truncf %165 : vector<1x128xf32> to vector<1x128xbf16>
    %cst_54 = arith.constant dense<0.000000e+00> : vector<1x128xf32>
    %169 = tpu.matmul %168, %18, %cst_54 {dimension_numbers = #tpu.dot_dimension_numbers<[1], [0], [0], [1], [0, 0, 1, 1], [], []>} : vector<1x128xbf16>, vector<128x128xbf16>, vector<1x128xf32> -> vector<1x128xf32>
    %170 = arith.addf %167, %169 : vector<1x128xf32>
    %171 = math.tanh %170 : vector<1x128xf32>
    %172 = arith.negf %170 : vector<1x128xf32>
    %173 = math.exp %172 : vector<1x128xf32>
    %cst_55 = arith.constant 1.000000e+00 : f32
    %174 = vector.broadcast %cst_55 : f32 to vector<1x128xf32>
    %175 = arith.addf %174, %173 : vector<1x128xf32>
    %176 = arith.divf %174, %175 : vector<1x128xf32>
    %177 = arith.select %24, %171, %176 : vector<1x128xi1>, vector<1x128xf32>
    %c64_i32_56 = arith.constant 64 : i32
    %178 = tpu.dynamic_rotate %177 by %c64_i32_56 dim 1 : vector<1x128xf32>, i32 -> vector<1x128xf32>
    %179 = arith.mulf %177, %178 : vector<1x128xf32>
    %180 = arith.mulf %177, %162 : vector<1x128xf32>
    %c32_i32_57 = arith.constant 32 : i32
    %181 = tpu.dynamic_rotate %179 by %c32_i32_57 dim 1 : vector<1x128xf32>, i32 -> vector<1x128xf32>
    %182 = arith.addf %181, %180 : vector<1x128xf32>
    %183 = math.tanh %182 : vector<1x128xf32>
    %c64_i32_58 = arith.constant 64 : i32
    %184 = tpu.dynamic_rotate %183 by %c64_i32_58 dim 1 : vector<1x128xf32>, i32 -> vector<1x128xf32>
    %185 = arith.mulf %177, %184 : vector<1x128xf32>
    %c7 = arith.constant 7 : index
    %c0_59 = arith.constant 0 : index
    %186 = vector.load %arg8[%c7, %c0_59] : memref<8x128xf32, #tpu.memory_space<vmem>>, vector<1x128xf32>
    tpu.vector_store %arg8[%c7, %c0_59], %185 {strides = array<i32>} : memref<8x128xf32, #tpu.memory_space<vmem>>, vector<1x128xf32>,
    %c0_60 = arith.constant 0 : index
    %c0_61 = arith.constant 0 : index
    %187 = vector.load %arg8[%c0_60, %c0_61] : memref<8x128xf32, #tpu.memory_space<vmem>>, vector<8x128xf32>
    %188 = arith.truncf %187 : vector<8x128xf32> to vector<8x128xbf16>
    %c0_62 = arith.constant 0 : index
    %c0_63 = arith.constant 0 : index
    %189 = vector.load %arg5[%c0_62, %c0_63] : memref<128x128xf32, #tpu.memory_space<vmem>>, vector<128x128xf32>
    %190 = arith.truncf %189 : vector<128x128xf32> to vector<128x128xbf16>
    %cst_64 = arith.constant dense<0.000000e+00> : vector<8x128xf32>
    %191 = tpu.matmul %188, %190, %cst_64 {dimension_numbers = #tpu.dot_dimension_numbers<[1], [0], [0], [1], [0, 0, 1, 1], [], []>} : vector<8x128xbf16>, vector<128x128xbf16>, vector<8x128xf32> -> vector<8x128xf32>
    %c0_65 = arith.constant 0 : index
    %c0_66 = arith.constant 0 : index
    %192 = vector.load %arg6[%c0_65, %c0_66] : memref<1x128xf32, #tpu.memory_space<vmem>>, vector<1x128xf32>
    %193 = vector.broadcast %192 : vector<1x128xf32> to vector<8x128xf32>
    %194 = arith.addf %191, %193 : vector<8x128xf32>
    %195 = tpu.iota {dimensions = array<i32: 1>} : vector<8x128xi32>
    %c8_i32 = arith.constant 8 : i32
    %196 = vector.broadcast %c8_i32 : i32 to vector<8x128xi32>
    %197 = arith.cmpi slt, %195, %196 : vector<8x128xi32>
    %cst_67 = arith.constant -1.000000e+30 : f32
    %198 = vector.broadcast %cst_67 : f32 to vector<8x128xf32>
    %199 = arith.select %197, %194, %198 : vector<8x128xi1>, vector<8x128xf32>
    %cst_68 = arith.constant dense<0xFF800000> : vector<8xf32>
    %200 = vector.multi_reduction <maximumf>, %199, %cst_68 [1] : vector<8x128xf32> to vector<8xf32>
    %201 = vector.shape_cast %200 : vector<8xf32> to vector<8x1xf32>
    %202 = vector.broadcast %201 : vector<8x1xf32> to vector<8x128xf32>
    %203 = arith.subf %199, %202 : vector<8x128xf32>
    %204 = math.exp %203 : vector<8x128xf32>
    %cst_69 = arith.constant dense<0.000000e+00> : vector<8xf32>
    %205 = vector.multi_reduction <add>, %204, %cst_69 [1] : vector<8x128xf32> to vector<8xf32>
    %206 = vector.shape_cast %205 : vector<8xf32> to vector<8x1xf32>
    %207 = math.log %206 : vector<8x1xf32>
    %208 = vector.broadcast %207 : vector<8x1xf32> to vector<8x128xf32>
    %209 = arith.subf %203, %208 : vector<8x128xf32>
    %c0_70 = arith.constant 0 : index
    %c0_71 = arith.constant 0 : index
    %210 = vector.load %arg7[%c0_70, %c0_71] : memref<8x128xf32, #tpu.memory_space<vmem>>, vector<8x128xf32>
    tpu.vector_store %arg7[%c0_70, %c0_71], %209 {strides = array<i32>} : memref<8x128xf32, #tpu.memory_space<vmem>>, vector<8x128xf32>,
    return
  }
}

</mosaic_0001>

<bundles_post_ra>
// kernel: tpu_custom_call.1
= control target key start
LH: loop header
LB: loop body
LE: loop exit
PB: predicated region body
PF: predicated region fallthrough
CT: control target
= control target key end

     0   :  { %12 = vsyncpa [#allocation4], 0  ;;  %s1727_s0 = inlined_call_operand.vmem [shape: s32[8,1], index: 0, kind: input, shape index: {}]   ;;  %s1728_s1 = inlined_call_operand.vmem [shape: f32[20,16], index: 1, kind: input, shape index: {}]   ;;  %s1729_s2 = inlined_call_operand.vmem [shape: f32[16,128], index: 2, kind: input, shape index: {}]   ;;  %s1730_s3 = inlined_call_operand.vmem [shape: f32[1,128], index: 3, kind: input, shape index: {}]   ;;  %s1731_s4 = inlined_call_operand.hbm [shape: f32[128,128], index: 4, kind: input, shape index: {}]   ;;  %s1732_s5 = inlined_call_operand.hbm [shape: f32[128,128], index: 5, kind: input, shape index: {}]   ;;  %s1733_s6 = inlined_call_operand.vmem [shape: f32[1,128], index: 6, kind: input, shape index: {}]   ;;  %s1734_s7 = inlined_call_operand.hbm [shape: f32[8,128], index: 7, kind: output, shape index: {}]  }
   0x1   :  { %13 = vsyncpa [#allocation7], 0 }
   0x2   :  { %14 = vsyncpa [#allocation5], 0  ;;  %s1406_s24 = smov [#allocation3]  }
   0x3   :  { %s28_s25 = sshll.u32 %s1406_s24, 4  ;;  %s29_s25 = int_to_ptr.vmem [resolvable:$true] %s28_s25 }
   0x4   :  { %s1348_s26 = scalar_lea.vmem %s29_s25, 2048  ;;  %p1353_p1 = scmp.lt.s32.totalorder %s29_s25, %s29_s25 }
   0x5   :  { %p1349_p0 = scmp.ne.s32.totalorder %s29_s25, %s1348_s26  ;;  %p1354_p2 = scmp.lt.s32.totalorder %s1348_s26, %s1348_s26 }
   0x7   :  { %p1355_p3 = por %p1354_p2, %p1353_p1 }
   0x9   :  { %p1356_p4 = pnand %p1355_p3, %p1349_p0 }
   0xb   :  { %1359 = shalt.err (!%p1356_p4)
}
   0xc   :  { %s1407_s27 = smov 128   ;;  %s1408_s28 = smov 8  }
   0xd   :  { %34 = dma.hbm_to_vmem [thread:$0]  %s1731_s4, 2048, %s29_s25, [#allocation4], %s1407_s27, %s1407_s27, %s1408_s28  }
   0xe   :  { %s1409_s8 = smov [#allocation6]  }
   0xf   :  { %s40_s9 = sshll.u32 %s1409_s8, 4  ;;  %s41_s9 = int_to_ptr.vmem [resolvable:$true] %s40_s9 }
  0x10   :  { %s1368_s10 = scalar_lea.vmem %s41_s9, 2048  ;;  %p1373_p6 = scmp.lt.s32.totalorder %s41_s9, %s41_s9 }
  0x11   :  { %p1369_p5 = scmp.ne.s32.totalorder %s41_s9, %s1368_s10  ;;  %p1374_p7 = scmp.lt.s32.totalorder %s1368_s10, %s1368_s10 }
  0x13   :  { %p1375_p8 = por %p1374_p7, %p1373_p6 }
  0x15   :  { %p1376_p9 = pnand %p1375_p8, %p1369_p5 }
  0x17   :  { %1379 = shalt.err (!%p1376_p9)
}
  0x18   :  { %46 = dma.hbm_to_vmem [thread:$0]  %s1732_s5, 2048, %s41_s9, [#allocation7], %s1407_s27, %s1407_s27, %s1408_s28  }
  0x19   :  { %1400 = dma.done.wait [#allocation4], 2048  }
  0x1a   :  { %1401 = vsyncadd [#allocation4], 4294965248 }
  0x1b   :  { %1402 = dma.done.wait [#allocation7], 2048  }
  0x1c   :  { %1403 = vsyncadd [#allocation7], 4294965248  ;;  %v1410_v0 = vmov 0   ;;  %v1411_v1 = vmov 0.0   ;;  %v56_v2 = vld [vmem:[%s1727_s0] sm:$0xff]  ;;  %vm75_vm0 = vcmask 1041408   ;;  %v57_v33 = vlaneseq }
  0x1d   :  { %1271 = vset.pattern.permute.xlu0 %v1410_v0  ;;  %1067 = vmatprep.subr.bf16.mxu0 %v1411_v1  ;;  %v68_v3 = vld [vmem:[%s1728_s1 + $0x10] sm:$0xf]  ;;  %v66_v4 = vld [vmem:[%s1728_s1] sm:$0xff]  ;;  %vm1412_vm1 = vmmov 0   ;;  %v67_v6 = vld [vmem:[%s1728_s1 + $0x8] sm:$0xff]  ;;  %vm71_vm3 = vcmask 162816  }
  0x1e   :  { %1081 = vmatprep.subr.bf16.mxu1 %v1411_v1  ;;  %1071 = vmatprep.mubr.msk.bf16.mxu0 %vm1412_vm1, %v1411_v1  ;;  %v70_v5 = vpack.c.bf16 %v68_v3, %v68_v3  ;;  %v188_v7 = vld [vmem:[#allocation3 + $0x70] sm:$0xff]  ;;  %v189_v8 = vld [vmem:[#allocation3 + $0x78] sm:$0xff]  ;;  %v186_v10 = vld [vmem:[#allocation3 + $0x60] sm:$0xff]  ;;  %v69_v13 = vpack.c.bf16 %v67_v6, %v66_v4  ;;  %v1532_v34 = vand.u32 127, %v57_v33  ;;  %vm130_vm4 = vcmask 130048   ;;  %s1414_s22 = smov 32  }
  0x1f   :  { %1097 = vmatprep.mubr.msk.bf16.mxu1 %vm1412_vm1, %v1411_v1  ;;  %60 = vperm.xlu0 %1271, %v56_v2   ;;  %v1480_v9 = vpack.c.bf16 %v189_v8, %v188_v7  ;;  %v187_v11 = vld [vmem:[#allocation3 + $0x68] sm:$0xff]  ;;  %v184_v15 = vld [vmem:[#allocation3 + $0x50] sm:$0xff]  ;;  %v185_v16 = vld [vmem:[#allocation3 + $0x58] sm:$0xff]  ;;  %s1415_s25 = smov [#allocation8]  }
  0x20   :  { %v77_v12 = vsel %vm75_vm0, %v70_v5, 0  ;;  %v1483_v14 = vpack.c.bf16 %v187_v11, %v186_v10  ;;  %v1488_v17 = vpack.c.bf16 %v185_v16, %v184_v15  ;;  %v182_v18 = vld [vmem:[#allocation3 + $0x40] sm:$0xff]  ;;  %v183_v19 = vld [vmem:[#allocation3 + $0x48] sm:$0xff]  ;;  %v180_v21 = vld [vmem:[#allocation3 + $0x30] sm:$0xff]  ;;  %vm198_vm5 = vcmp.ge.s32.totalorder %v1532_v34, 64 }
  0x21   :  { %1068 = vmatpush3.bf16.msra.mxu0 %v77_v12  ;;  %1082 = vmatpush3.bf16.msra.mxu1 %v1480_v9  ;;  %v1493_v20 = vpack.c.bf16 %v183_v19, %v182_v18  ;;  %v181_v22 = vld [vmem:[#allocation3 + $0x38] sm:$0xff]  ;;  %v178_v24 = vld [vmem:[#allocation3 + $0x20] sm:$0xff]  ;;  %v179_v25 = vld [vmem:[#allocation3 + $0x28] sm:$0xff]  ;;  %vm199_vm6 = vcmp.lt.s32.totalorder %v1532_v34, 96  ;;  %vm939_vm8 = vcmp.lt.s32.totalorder %v1532_v34, 8 }
  0x22   :  { %1069 = vmatprep.subr.bf16.mxu0 %v1411_v1  ;;  %1083 = vmatprep.subr.bf16.mxu1 %v1411_v1  ;;  %v1497_v23 = vpack.c.bf16 %v181_v22, %v180_v21  ;;  %v1501_v26 = vpack.c.bf16 %v179_v25, %v178_v24  ;;  %v176_v27 = vld [vmem:[#allocation3 + $0x10] sm:$0xff]  ;;  %v177_v28 = vld [vmem:[#allocation3 + $0x18] sm:$0xff]  ;;  %v174_v30 = vld [vmem:[#allocation3] sm:$0xff] }
  0x23   :  { %v1505_v29 = vpack.c.bf16 %v177_v28, %v176_v27  ;;  %v175_v31 = vld [vmem:[#allocation3 + $0x8] sm:$0xff]  ;;  %v120_v35 = vld [vmem:[%s1729_s2] sm:$0xff]  ;;  %v121_v36 = vld [vmem:[%s1729_s2 + $0x8] sm:$0xff] }
  0x24   :  { %v1509_v32 = vpack.c.bf16 %v175_v31, %v174_v30  ;;  %v122_v39 = vpack.c.bf16 %v121_v36, %v120_v35  ;;  %v970_v50 = vld [vmem:[%s1730_s3] ss:$0 sm:$0xff]  ;;  %vm1571_vm7 = vmand %vm198_vm5, %vm199_vm6  ;;  %s1413_s3 = smov 64   ;;  %v878_v60 = vld [vmem:[#allocation6 + $0x50] sm:$0xff] }
  0x25   :  { %1070 = vmatpush3.bf16.msra.mxu0 %v69_v13  ;;  %1084 = vmatpush3.bf16.msra.mxu1 %v1483_v14 }
  0x26   :  { %1085 = vmatprep.subr.bf16.mxu1 %v1411_v1  ;;  %1075 = vmatprep.subr.bf16.mxu0 %v1411_v1 }
  0x29   :  { %1086 = vmatpush3.bf16.msra.mxu1 %v1488_v17 }
  0x2a   :  { %1087 = vmatprep.subr.bf16.mxu1 %v1411_v1 }
  0x2d   :  { %1088 = vmatpush3.bf16.msra.mxu1 %v1493_v20 }
  0x2e   :  { %1089 = vmatprep.subr.bf16.mxu1 %v1411_v1 }
  0x31   :  { %1090 = vmatpush3.bf16.msra.mxu1 %v1497_v23 }
  0x32   :  { %1091 = vmatprep.subr.bf16.mxu1 %v1411_v1 }
  0x35   :  { %1092 = vmatpush3.bf16.msra.mxu1 %v1501_v26 }
  0x36   :  { %1093 = vmatprep.subr.bf16.mxu1 %v1411_v1 }
  0x39   :  { %1094 = vmatpush3.bf16.msra.mxu1 %v1505_v29 }
  0x3a   :  { %1095 = vmatprep.subr.bf16.mxu1 %v1411_v1 }
  0x3d   :  { %1096 = vmatpush3.bf16.msra.mxu1 %v1509_v32 }
  0x3e   :  { %1121 = vmatprep.subr.bf16.mxu1 %v1411_v1 }
  0x40   :  { %1098 = vmatmul.mubr.bf16.vlgmr.msra.gmra.mxu1 %v1410_v0 }
  0x41   :  { %1122 = vmatpush3.bf16.msra.mxu1 %v1480_v9  ;;  %1137 = vmatprep.mubr.msk.bf16.mxu1 %vm1412_vm1, %v1411_v1 }
  0x42   :  { %1123 = vmatprep.subr.bf16.mxu1 %v1411_v1 }
  0x45   :  { %1124 = vmatpush3.bf16.msra.mxu1 %v1483_v14 }
  0x46   :  { %1125 = vmatprep.subr.bf16.mxu1 %v1411_v1 }
  0x49   :  { %1126 = vmatpush3.bf16.msra.mxu1 %v1488_v17 }
  0x4a   :  { %1127 = vmatprep.subr.bf16.mxu1 %v1411_v1 }
  0x4d   :  { %1128 = vmatpush3.bf16.msra.mxu1 %v1493_v20 }
  0x4e   :  { %1129 = vmatprep.subr.bf16.mxu1 %v1411_v1 }
  0x51   :  { %1130 = vmatpush3.bf16.msra.mxu1 %v1497_v23 }
  0x52   :  { %1131 = vmatprep.subr.bf16.mxu1 %v1411_v1 }
  0x55   :  { %1132 = vmatpush3.bf16.msra.mxu1 %v1501_v26 }
  0x56   :  { %1133 = vmatprep.subr.bf16.mxu1 %v1411_v1 }
  0x59   :  { %1134 = vmatpush3.bf16.msra.mxu1 %v1505_v29 }
  0x5a   :  { %1135 = vmatprep.subr.bf16.mxu1 %v1411_v1 }
  0x5d   :  { %1136 = vmatpush3.bf16.msra.mxu1 %v1509_v32 }
  0x5e   :  { %1161 = vmatprep.subr.bf16.mxu1 %v1411_v1 }
  0x9a   :  { %v61_v37 = vpop.permute.xlu0 %60 }
  0x9b   :  { %vm62_vm2 = vcmp.eq.s32.totalorder %v1532_v34, %v61_v37 }
  0x9c   :  { %v968_v38 = vsel %vm62_vm2, 1.0, %v1411_v1 }
  0x9d   :  { %v65_v40 = vpack.c.bf16 %v968_v38, %v968_v38 }
  0x9f   :  { %1072 = vmatmul.mubr.msk.bf16.vlgmr.msra.gmra.mxu0 %vm71_vm3, %v65_v40 }
  0xa0   :  { %1076 = vmatpush3.bf16.msra.mxu0 %v122_v39  ;;  %1077 = vmatprep.mubr.msk.bf16.mxu0 %vm1412_vm1, %v1411_v1 }
  0xa1   :  { %1101 = vmatprep.subr.bf16.mxu0 %v1411_v1 }
 0x100   :  { %v235_v41 = vpop.f32.mrf.mxu1 }
 0x102   :  { %v1099_v42 = vpop.f32.mrf.mxu1 }
 0x104   :  { %v238_v43 = vpop.f32.mrf.mxu1 }
 0x106   :  { %v1100_v44 = vpop.f32.mrf.mxu1 }
 0x15f   :  { %v113_v45 = vpop.f32.mrf.mxu0 }
 0x160   :  { %v119_v46 = vpack.c.bf16 %v113_v45, %v113_v45 }
 0x161   :  { %v1073_v47 = vpop.f32.mrf.mxu0 }
 0x162   :  { %1078 = vmatmul.mubr.msk.bf16.vlgmr.msra.gmra.mxu0 %vm130_vm4, %v119_v46 }
 0x163   :  { %v116_v48 = vpop.f32.mrf.mxu0  ;;  %1102 = vmatpush3.bf16.msra.mxu0 %v1480_v9  ;;  %1117 = vmatprep.mubr.msk.bf16.mxu0 %vm1412_vm1, %v1411_v1 }
 0x164   :  { %1103 = vmatprep.subr.bf16.mxu0 %v1411_v1 }
 0x165   :  { %v1074_v49 = vpop.f32.mrf.mxu0 }
 0x167   :  { %1104 = vmatpush3.bf16.msra.mxu0 %v1483_v14 }
 0x168   :  { %1105 = vmatprep.subr.bf16.mxu0 %v1411_v1 }
 0x16b   :  { %1106 = vmatpush3.bf16.msra.mxu0 %v1488_v17 }
 0x16c   :  { %1107 = vmatprep.subr.bf16.mxu0 %v1411_v1 }
 0x16f   :  { %1108 = vmatpush3.bf16.msra.mxu0 %v1493_v20 }
 0x170   :  { %1109 = vmatprep.subr.bf16.mxu0 %v1411_v1 }
 0x173   :  { %1110 = vmatpush3.bf16.msra.mxu0 %v1497_v23 }
 0x174   :  { %1111 = vmatprep.subr.bf16.mxu0 %v1411_v1 }
 0x177   :  { %1112 = vmatpush3.bf16.msra.mxu0 %v1501_v26 }
 0x178   :  { %1113 = vmatprep.subr.bf16.mxu0 %v1411_v1 }
 0x17b   :  { %1114 = vmatpush3.bf16.msra.mxu0 %v1505_v29 }
 0x17c   :  { %1115 = vmatprep.subr.bf16.mxu0 %v1411_v1 }
 0x17f   :  { %1116 = vmatpush3.bf16.msra.mxu0 %v1509_v32 }
 0x180   :  { %1141 = vmatprep.subr.bf16.mxu0 %v1411_v1 }
 0x222   :  { %v168_v51 = vpop.f32.mrf.mxu0 }
 0x223   :  { %v1566_v52 = vadd.f32 %v970_v50, %v168_v51 }
 0x224   :  { %v1079_v53 = vpop.f32.mrf.mxu0 }
 0x225   :  { %v241_v54 = vadd.f32 %v235_v41, %v1566_v52 }
 0x226   :  { %v171_v55 = vpop.f32.mrf.mxu0 }
 0x227   :  { %v972_v56 = vmul.f32 -1.442695, %v241_v54 }
 0x228   :  { %v1080_v57 = vpop.f32.mrf.mxu0 }
 0x229   :  { %1272 = vpow2.f32 %v972_v56 }
 0x22a   :  { %1274 = vtanh.f32 %v241_v54 }
 0x236   :  { %v1273_v58 = vpop.eup %1272 }
 0x237   :  { %v246_v59 = vadd.f32 1.0, %v1273_v58  ;;  %v1275_v61 = vpop.eup %1274 }
 0x239   :  { %1276 = vrcp.f32 %v246_v59 }
 0x246   :  { %v1277_v62 = vpop.eup %1276 }
 0x247   :  { %v249_v63 = vsel %vm1571_vm7, %v1275_v61, %v1277_v62 }
 0x248   :  { %250 = vrot.lane.b32.xlu0 %v249_v63, %s1413_s3  ;;  %v253_v3 = vmul.f32 0.0, %v249_v63 }
 0x2ba   :  { %v251_v0 = vpop.permute.xlu0 %250 }
 0x2bb   :  { %v252_v2 = vmul.f32 %v251_v0, %v249_v63 }
 0x2bd   :  { %254 = vrot.lane.b32.xlu1 %v252_v2, %s1414_s22 }
 0x32f   :  { %v255_v4 = vpop.permute.xlu1 %254 }
 0x330   :  { %v256_v5 = vadd.f32 %v255_v4, %v253_v3 }
 0x332   :  { %1278 = vtanh.f32 %v256_v5  ;;  %v325_v36 = vrot.slane %v256_v5, 7 }
 0x33f   :  { %v1279_v6 = vpop.eup %1278 }
 0x340   :  { %258 = vrot.lane.b32.xlu1 %v1279_v6, %s1413_s3 }
 0x3b2   :  { %v259_v7 = vpop.permute.xlu1 %258 }
 0x3b3   :  { %v260_v8 = vmul.f32 %v259_v7, %v249_v63 }
 0x3b5   :  { %261 = vst [vmem:[#allocation2] sm:$0x1] %v260_v8  ;;  %v262_v10 = vpack.c.bf16 %v260_v8, %v260_v8 }
 0x3b7   :  { %1118 = vmatmul.mubr.bf16.vlgmr.msra.gmra.mxu0 %v262_v10 }
 0x3b8   :  { %1142 = vmatpush3.bf16.msra.mxu0 %v1480_v9  ;;  %1157 = vmatprep.mubr.msk.bf16.mxu0 %vm1412_vm1, %v1411_v1 }
 0x3b9   :  { %1143 = vmatprep.subr.bf16.mxu0 %v1411_v1 }
 0x3bc   :  { %1144 = vmatpush3.bf16.msra.mxu0 %v1483_v14 }
 0x3bd   :  { %1145 = vmatprep.subr.bf16.mxu0 %v1411_v1 }
 0x3c0   :  { %1146 = vmatpush3.bf16.msra.mxu0 %v1488_v17 }
 0x3c1   :  { %1147 = vmatprep.subr.bf16.mxu0 %v1411_v1 }
 0x3c4   :  { %1148 = vmatpush3.bf16.msra.mxu0 %v1493_v20 }
 0x3c5   :  { %1149 = vmatprep.subr.bf16.mxu0 %v1411_v1 }
 0x3c8   :  { %1150 = vmatpush3.bf16.msra.mxu0 %v1497_v23 }
 0x3c9   :  { %1151 = vmatprep.subr.bf16.mxu0 %v1411_v1 }
 0x3cc   :  { %1152 = vmatpush3.bf16.msra.mxu0 %v1501_v26 }
 0x3cd   :  { %1153 = vmatprep.subr.bf16.mxu0 %v1411_v1 }
 0x3d0   :  { %1154 = vmatpush3.bf16.msra.mxu0 %v1505_v29 }
 0x3d1   :  { %1155 = vmatprep.subr.bf16.mxu0 %v1411_v1 }
 0x3d4   :  { %1156 = vmatpush3.bf16.msra.mxu0 %v1509_v32 }
 0x3d5   :  { %1181 = vmatprep.subr.bf16.mxu0 %v1411_v1 }
 0x477   :  { %v297_v11 = vpop.f32.mrf.mxu0 }
 0x478   :  { %v304_v12 = vrot.slane %v297_v11, 7 }
 0x479   :  { %v1119_v13 = vpop.f32.mrf.mxu0 }
 0x47a   :  { %v306_v15 = vadd.f32 %v304_v12, %v1566_v52 }
 0x47b   :  { %v300_v16 = vpop.f32.mrf.mxu0 }
 0x47c   :  { %v973_v18 = vmul.f32 -1.442695, %v306_v15 }
 0x47d   :  { %v1120_v19 = vpop.f32.mrf.mxu0 }
 0x47e   :  { %1280 = vpow2.f32 %v973_v18 }
 0x47f   :  { %1282 = vtanh.f32 %v306_v15 }
 0x48b   :  { %v1281_v21 = vpop.eup %1280 }
 0x48c   :  { %v311_v22 = vadd.f32 1.0, %v1281_v21  ;;  %v1283_v24 = vpop.eup %1282 }
 0x48e   :  { %1284 = vrcp.f32 %v311_v22 }
 0x49b   :  { %v1285_v25 = vpop.eup %1284 }
 0x49c   :  { %v314_v27 = vsel %vm1571_vm7, %v1283_v24, %v1285_v25 }
 0x49d   :  { %v316_v28 = vrot.slane %v314_v27, 1  ;;  %v327_v37 = vmul.f32 %v325_v36, %v314_v27 }
 0x49f   :  { %318 = vrot.lane.b32.xlu0 %v316_v28, %s1413_s3  ;;  %v334_v38 = vrot.slane %v327_v37, 1 }
 0x511   :  { %v319_v30 = vpop.permute.xlu0 %318 }
 0x512   :  { %v321_v31 = vrot.slane %v319_v30, 7 }
 0x514   :  { %v323_v33 = vmul.f32 %v321_v31, %v314_v27 }
 0x516   :  { %v329_v35 = vrot.slane %v323_v33, 1 }
 0x518   :  { %331 = vrot.lane.b32.xlu1 %v329_v35, %s1414_s22 }
 0x58a   :  { %v332_v39 = vpop.permute.xlu1 %331 }
 0x58b   :  { %v336_v40 = vadd.f32 %v334_v38, %v332_v39 }
 0x58d   :  { %1286 = vtanh.f32 %v336_v40  ;;  %v412_v3 = vrot.slane %v336_v40, 6 }
 0x59a   :  { %v1287_v41 = vpop.eup %1286 }
 0x59b   :  { %338 = vrot.lane.b32.xlu0 %v1287_v41, %s1413_s3 }
 0x60d   :  { %v339_v42 = vpop.permute.xlu0 %338 }
 0x60e   :  { %v341_v43 = vrot.slane %v339_v42, 7 }
 0x610   :  { %v343_v44 = vmul.f32 %v341_v43, %v314_v27 }
 0x612   :  { %344 = vst [vmem:[#allocation2] sm:$0x2] %v343_v44  ;;  %v345_v45 = vpack.c.bf16 %v343_v44, %v343_v44 }
 0x614   :  { %v347_v46 = vshrl.u32 %v345_v45, 16 }
 0x616   :  { %1138 = vmatmul.mubr.bf16.vlgmr.msra.gmra.mxu1 %v347_v46 }
 0x617   :  { %1162 = vmatpush3.bf16.msra.mxu1 %v1480_v9  ;;  %1177 = vmatprep.mubr.msk.bf16.mxu1 %vm1412_vm1, %v1411_v1 }
 0x618   :  { %1163 = vmatprep.subr.bf16.mxu1 %v1411_v1 }
 0x61b   :  { %1164 = vmatpush3.bf16.msra.mxu1 %v1483_v14 }
 0x61c   :  { %1165 = vmatprep.subr.bf16.mxu1 %v1411_v1 }
 0x61f   :  { %1166 = vmatpush3.bf16.msra.mxu1 %v1488_v17 }
 0x620   :  { %1167 = vmatprep.subr.bf16.mxu1 %v1411_v1 }
 0x623   :  { %1168 = vmatpush3.bf16.msra.mxu1 %v1493_v20 }
 0x624   :  { %1169 = vmatprep.subr.bf16.mxu1 %v1411_v1 }
 0x627   :  { %1170 = vmatpush3.bf16.msra.mxu1 %v1497_v23 }
 0x628   :  { %1171 = vmatprep.subr.bf16.mxu1 %v1411_v1 }
 0x62b   :  { %1172 = vmatpush3.bf16.msra.mxu1 %v1501_v26 }
 0x62c   :  { %1173 = vmatprep.subr.bf16.mxu1 %v1411_v1 }
 0x62f   :  { %1174 = vmatpush3.bf16.msra.mxu1 %v1505_v29 }
 0x630   :  { %1175 = vmatprep.subr.bf16.mxu1 %v1411_v1 }
 0x633   :  { %1176 = vmatpush3.bf16.msra.mxu1 %v1509_v32 }
 0x634   :  { %1201 = vmatprep.subr.bf16.mxu1 %v1411_v1 }
 0x6d6   :  { %v384_v47 = vpop.f32.mrf.mxu1 }
 0x6d7   :  { %v391_v48 = vrot.slane %v384_v47, 6 }
 0x6d8   :  { %v1139_v49 = vpop.f32.mrf.mxu1 }
 0x6d9   :  { %v393_v50 = vadd.f32 %v391_v48, %v1566_v52 }
 0x6da   :  { %v387_v51 = vpop.f32.mrf.mxu1 }
 0x6db   :  { %v974_v53 = vmul.f32 -1.442695, %v393_v50 }
 0x6dc   :  { %v1140_v54 = vpop.f32.mrf.mxu1 }
 0x6dd   :  { %1288 = vpow2.f32 %v974_v53 }
 0x6de   :  { %1290 = vtanh.f32 %v393_v50 }
 0x6ea   :  { %v1289_v55 = vpop.eup %1288 }
 0x6eb   :  { %v398_v56 = vadd.f32 1.0, %v1289_v55  ;;  %v1291_v57 = vpop.eup %1290 }
 0x6ed   :  { %1292 = vrcp.f32 %v398_v56 }
 0x6fa   :  { %v1293_v58 = vpop.eup %1292 }
 0x6fb   :  { %v401_v59 = vsel %vm1571_vm7, %v1291_v57, %v1293_v58 }
 0x6fc   :  { %v403_v61 = vrot.slane %v401_v59, 2  ;;  %v414_v4 = vmul.f32 %v412_v3, %v401_v59 }
 0x6fe   :  { %405 = vrot.lane.b32.xlu1 %v403_v61, %s1413_s3  ;;  %v421_v5 = vrot.slane %v414_v4, 2 }
 0x770   :  { %v406_v62 = vpop.permute.xlu1 %405 }
 0x771   :  { %v408_v63 = vrot.slane %v406_v62, 6 }
 0x773   :  { %v410_v0 = vmul.f32 %v408_v63, %v401_v59 }
 0x775   :  { %v416_v2 = vrot.slane %v410_v0, 2 }
 0x777   :  { %418 = vrot.lane.b32.xlu0 %v416_v2, %s1414_s22 }
 0x7e9   :  { %v419_v6 = vpop.permute.xlu0 %418 }
 0x7ea   :  { %v423_v7 = vadd.f32 %v421_v5, %v419_v6 }
 0x7ec   :  { %1294 = vtanh.f32 %v423_v7  ;;  %v498_v40 = vrot.slane %v423_v7, 5 }
 0x7f9   :  { %v1295_v8 = vpop.eup %1294 }
 0x7fa   :  { %425 = vrot.lane.b32.xlu1 %v1295_v8, %s1413_s3 }
 0x86c   :  { %v426_v10 = vpop.permute.xlu1 %425 }
 0x86d   :  { %v428_v11 = vrot.slane %v426_v10, 6 }
 0x86f   :  { %v430_v12 = vmul.f32 %v428_v11, %v401_v59 }
 0x871   :  { %431 = vst [vmem:[#allocation2] sm:$0x4] %v430_v12  ;;  %v432_v13 = vpack.c.bf16 %v430_v12, %v430_v12 }
 0x873   :  { %v434_v15 = vrot.slane %v432_v13, 1 }
 0x875   :  { %1158 = vmatmul.mubr.bf16.vlgmr.msra.gmra.mxu0 %v434_v15 }
 0x876   :  { %1182 = vmatpush3.bf16.msra.mxu0 %v1480_v9  ;;  %1197 = vmatprep.mubr.msk.bf16.mxu0 %vm1412_vm1, %v1411_v1 }
 0x877   :  { %1183 = vmatprep.subr.bf16.mxu0 %v1411_v1 }
 0x87a   :  { %1184 = vmatpush3.bf16.msra.mxu0 %v1483_v14 }
 0x87b   :  { %1185 = vmatprep.subr.bf16.mxu0 %v1411_v1 }
 0x87e   :  { %1186 = vmatpush3.bf16.msra.mxu0 %v1488_v17 }
 0x87f   :  { %1187 = vmatprep.subr.bf16.mxu0 %v1411_v1 }
 0x882   :  { %1188 = vmatpush3.bf16.msra.mxu0 %v1493_v20 }
 0x883   :  { %1189 = vmatprep.subr.bf16.mxu0 %v1411_v1 }
 0x886   :  { %1190 = vmatpush3.bf16.msra.mxu0 %v1497_v23 }
 0x887   :  { %1191 = vmatprep.subr.bf16.mxu0 %v1411_v1 }
 0x88a   :  { %1192 = vmatpush3.bf16.msra.mxu0 %v1501_v26 }
 0x88b   :  { %1193 = vmatprep.subr.bf16.mxu0 %v1411_v1 }
 0x88e   :  { %1194 = vmatpush3.bf16.msra.mxu0 %v1505_v29 }
 0x88f   :  { %1195 = vmatprep.subr.bf16.mxu0 %v1411_v1 }
 0x892   :  { %1196 = vmatpush3.bf16.msra.mxu0 %v1509_v32 }
 0x893   :  { %1221 = vmatprep.subr.bf16.mxu0 %v1411_v1 }
 0x935   :  { %v470_v16 = vpop.f32.mrf.mxu0 }
 0x936   :  { %v477_v18 = vrot.slane %v470_v16, 5 }
 0x937   :  { %v1159_v19 = vpop.f32.mrf.mxu0 }
 0x938   :  { %v479_v21 = vadd.f32 %v477_v18, %v1566_v52 }
 0x939   :  { %v473_v22 = vpop.f32.mrf.mxu0 }
 0x93a   :  { %v975_v24 = vmul.f32 -1.442695, %v479_v21 }
 0x93b   :  { %v1160_v25 = vpop.f32.mrf.mxu0 }
 0x93c   :  { %1296 = vpow2.f32 %v975_v24 }
 0x93d   :  { %1298 = vtanh.f32 %v479_v21 }
 0x949   :  { %v1297_v27 = vpop.eup %1296 }
 0x94a   :  { %v484_v28 = vadd.f32 1.0, %v1297_v27  ;;  %v1299_v30 = vpop.eup %1298 }
 0x94c   :  { %1300 = vrcp.f32 %v484_v28 }
 0x959   :  { %v1301_v31 = vpop.eup %1300 }
 0x95a   :  { %v487_v33 = vsel %vm1571_vm7, %v1299_v30, %v1301_v31 }
 0x95b   :  { %v489_v35 = vrot.slane %v487_v33, 3  ;;  %v500_v41 = vmul.f32 %v498_v40, %v487_v33 }
 0x95d   :  { %491 = vrot.lane.b32.xlu0 %v489_v35, %s1413_s3  ;;  %v507_v42 = vrot.slane %v500_v41, 3 }
 0x9cf   :  { %v492_v36 = vpop.permute.xlu0 %491 }
 0x9d0   :  { %v494_v37 = vrot.slane %v492_v36, 5 }
 0x9d2   :  { %v496_v38 = vmul.f32 %v494_v37, %v487_v33 }
 0x9d4   :  { %v502_v39 = vrot.slane %v496_v38, 3 }
 0x9d6   :  { %504 = vrot.lane.b32.xlu1 %v502_v39, %s1414_s22 }
 0xa48   :  { %v505_v43 = vpop.permute.xlu1 %504 }
 0xa49   :  { %v509_v44 = vadd.f32 %v507_v42, %v505_v43 }
 0xa4b   :  { %1302 = vtanh.f32 %v509_v44  ;;  %v586_v8 = vrot.slane %v509_v44, 4 }
 0xa58   :  { %v1303_v45 = vpop.eup %1302 }
 0xa59   :  { %511 = vrot.lane.b32.xlu0 %v1303_v45, %s1413_s3 }
 0xacb   :  { %v512_v46 = vpop.permute.xlu0 %511 }
 0xacc   :  { %v514_v47 = vrot.slane %v512_v46, 5 }
 0xace   :  { %v516_v48 = vmul.f32 %v514_v47, %v487_v33 }
 0xad0   :  { %517 = vst [vmem:[#allocation2] sm:$0x8] %v516_v48  ;;  %v518_v49 = vpack.c.bf16 %v516_v48, %v516_v48 }
 0xad2   :  { %v520_v50 = vshrl.u32 %v518_v49, 16 }
 0xad4   :  { %v522_v51 = vrot.slane %v520_v50, 1 }
 0xad6   :  { %1178 = vmatmul.mubr.bf16.vlgmr.msra.gmra.mxu1 %v522_v51 }
 0xad7   :  { %1202 = vmatpush3.bf16.msra.mxu1 %v1480_v9  ;;  %1217 = vmatprep.mubr.msk.bf16.mxu1 %vm1412_vm1, %v1411_v1 }
 0xad8   :  { %1203 = vmatprep.subr.bf16.mxu1 %v1411_v1 }
 0xadb   :  { %1204 = vmatpush3.bf16.msra.mxu1 %v1483_v14 }
 0xadc   :  { %1205 = vmatprep.subr.bf16.mxu1 %v1411_v1 }
 0xadf   :  { %1206 = vmatpush3.bf16.msra.mxu1 %v1488_v17 }
 0xae0   :  { %1207 = vmatprep.subr.bf16.mxu1 %v1411_v1 }
 0xae3   :  { %1208 = vmatpush3.bf16.msra.mxu1 %v1493_v20 }
 0xae4   :  { %1209 = vmatprep.subr.bf16.mxu1 %v1411_v1 }
 0xae7   :  { %1210 = vmatpush3.bf16.msra.mxu1 %v1497_v23 }
 0xae8   :  { %1211 = vmatprep.subr.bf16.mxu1 %v1411_v1 }
 0xaeb   :  { %1212 = vmatpush3.bf16.msra.mxu1 %v1501_v26 }
 0xaec   :  { %1213 = vmatprep.subr.bf16.mxu1 %v1411_v1 }
 0xaef   :  { %1214 = vmatpush3.bf16.msra.mxu1 %v1505_v29 }
 0xaf0   :  { %1215 = vmatprep.subr.bf16.mxu1 %v1411_v1 }
 0xaf3   :  { %1216 = vmatpush3.bf16.msra.mxu1 %v1509_v32 }
 0xaf4   :  { %1241 = vmatprep.subr.bf16.mxu1 %v1411_v1 }
 0xb96   :  { %v558_v53 = vpop.f32.mrf.mxu1 }
 0xb97   :  { %v565_v54 = vrot.slane %v558_v53, 4 }
 0xb98   :  { %v1179_v55 = vpop.f32.mrf.mxu1 }
 0xb99   :  { %v567_v56 = vadd.f32 %v565_v54, %v1566_v52 }
 0xb9a   :  { %v561_v57 = vpop.f32.mrf.mxu1 }
 0xb9b   :  { %v976_v58 = vmul.f32 -1.442695, %v567_v56 }
 0xb9c   :  { %v1180_v59 = vpop.f32.mrf.mxu1 }
 0xb9d   :  { %1304 = vpow2.f32 %v976_v58 }
 0xb9e   :  { %1306 = vtanh.f32 %v567_v56 }
 0xbaa   :  { %v1305_v61 = vpop.eup %1304 }
 0xbab   :  { %v572_v62 = vadd.f32 1.0, %v1305_v61  ;;  %v1307_v63 = vpop.eup %1306 }
 0xbad   :  { %1308 = vrcp.f32 %v572_v62 }
 0xbba   :  { %v1309_v0 = vpop.eup %1308 }
 0xbbb   :  { %v575_v2 = vsel %vm1571_vm7, %v1307_v63, %v1309_v0 }
 0xbbc   :  { %v577_v3 = vrot.slane %v575_v2, 4  ;;  %v588_v10 = vmul.f32 %v586_v8, %v575_v2 }
 0xbbe   :  { %579 = vrot.lane.b32.xlu1 %v577_v3, %s1413_s3  ;;  %v595_v11 = vrot.slane %v588_v10, 4 }
 0xc30   :  { %v580_v4 = vpop.permute.xlu1 %579 }
 0xc31   :  { %v582_v5 = vrot.slane %v580_v4, 4 }
 0xc33   :  { %v584_v6 = vmul.f32 %v582_v5, %v575_v2 }
 0xc35   :  { %v590_v7 = vrot.slane %v584_v6, 4 }
 0xc37   :  { %592 = vrot.lane.b32.xlu0 %v590_v7, %s1414_s22 }
 0xca9   :  { %v593_v12 = vpop.permute.xlu0 %592 }
 0xcaa   :  { %v597_v13 = vadd.f32 %v595_v11, %v593_v12 }
 0xcac   :  { %1310 = vtanh.f32 %v597_v13  ;;  %v672_v37 = vrot.slane %v597_v13, 3 }
 0xcb9   :  { %v1311_v15 = vpop.eup %1310 }
 0xcba   :  { %599 = vrot.lane.b32.xlu1 %v1311_v15, %s1413_s3 }
 0xd2c   :  { %v600_v16 = vpop.permute.xlu1 %599 }
 0xd2d   :  { %v602_v18 = vrot.slane %v600_v16, 4 }
 0xd2f   :  { %v604_v19 = vmul.f32 %v602_v18, %v575_v2 }
 0xd31   :  { %605 = vst [vmem:[#allocation2] sm:$0x10] %v604_v19  ;;  %v606_v21 = vpack.c.bf16 %v604_v19, %v604_v19 }
 0xd33   :  { %v608_v22 = vrot.slane %v606_v21, 2 }
 0xd35   :  { %1198 = vmatmul.mubr.bf16.vlgmr.msra.gmra.mxu0 %v608_v22 }
 0xd36   :  { %1222 = vmatpush3.bf16.msra.mxu0 %v1480_v9  ;;  %1237 = vmatprep.mubr.msk.bf16.mxu0 %vm1412_vm1, %v1411_v1 }
 0xd37   :  { %1223 = vmatprep.subr.bf16.mxu0 %v1411_v1 }
 0xd3a   :  { %1224 = vmatpush3.bf16.msra.mxu0 %v1483_v14 }
 0xd3b   :  { %1225 = vmatprep.subr.bf16.mxu0 %v1411_v1 }
 0xd3e   :  { %1226 = vmatpush3.bf16.msra.mxu0 %v1488_v17 }
 0xd3f   :  { %1227 = vmatprep.subr.bf16.mxu0 %v1411_v1 }
 0xd42   :  { %1228 = vmatpush3.bf16.msra.mxu0 %v1493_v20 }
 0xd43   :  { %1229 = vmatprep.subr.bf16.mxu0 %v1411_v1 }
 0xd46   :  { %1230 = vmatpush3.bf16.msra.mxu0 %v1497_v23 }
 0xd47   :  { %1231 = vmatprep.subr.bf16.mxu0 %v1411_v1 }
 0xd4a   :  { %1232 = vmatpush3.bf16.msra.mxu0 %v1501_v26 }
 0xd4b   :  { %1233 = vmatprep.subr.bf16.mxu0 %v1411_v1 }
 0xd4e   :  { %1234 = vmatpush3.bf16.msra.mxu0 %v1505_v29 }
 0xd4f   :  { %1235 = vmatprep.subr.bf16.mxu0 %v1411_v1 }
 0xd52   :  { %1236 = vmatpush3.bf16.msra.mxu0 %v1509_v32 }
 0xdf5   :  { %v644_v9 = vpop.f32.mrf.mxu0 }
 0xdf6   :  { %v651_v14 = vrot.slane %v644_v9, 3 }
 0xdf7   :  { %v1199_v17 = vpop.f32.mrf.mxu0 }
 0xdf8   :  { %v653_v20 = vadd.f32 %v651_v14, %v1566_v52 }
 0xdf9   :  { %v647_v24 = vpop.f32.mrf.mxu0 }
 0xdfa   :  { %v977_v25 = vmul.f32 -1.442695, %v653_v20 }
 0xdfb   :  { %v1200_v23 = vpop.f32.mrf.mxu0 }
 0xdfc   :  { %1312 = vpow2.f32 %v977_v25 }
 0xdfd   :  { %1314 = vtanh.f32 %v653_v20 }
 0xe09   :  { %v1313_v27 = vpop.eup %1312 }
 0xe0a   :  { %v658_v28 = vadd.f32 1.0, %v1313_v27  ;;  %v1315_v26 = vpop.eup %1314 }
 0xe0c   :  { %1316 = vrcp.f32 %v658_v28 }
 0xe19   :  { %v1317_v30 = vpop.eup %1316 }
 0xe1a   :  { %v661_v29 = vsel %vm1571_vm7, %v1315_v26, %v1317_v30 }
 0xe1b   :  { %v663_v31 = vrot.slane %v661_v29, 5  ;;  %v674_v38 = vmul.f32 %v672_v37, %v661_v29  ;;  %v881_v37 = vld [vmem:[#allocation6 + $0x68] sm:$0xff] }
 0xe1d   :  { %665 = vrot.lane.b32.xlu0 %v663_v31, %s1413_s3  ;;  %v681_v39 = vrot.slane %v674_v38, 5 }
 0xe8f   :  { %v666_v32 = vpop.permute.xlu0 %665 }
 0xe90   :  { %v668_v33 = vrot.slane %v666_v32, 3  ;;  %v882_v32 = vld [vmem:[#allocation6 + $0x70] sm:$0xff] }
 0xe92   :  { %v670_v35 = vmul.f32 %v668_v33, %v661_v29  ;;  %v883_v33 = vld [vmem:[#allocation6 + $0x78] sm:$0xff] }
 0xe94   :  { %v676_v36 = vrot.slane %v670_v35, 5  ;;  %v880_v35 = vld [vmem:[#allocation6 + $0x60] sm:$0xff] }
 0xe95   :  { %v890_v38 = vpack.c.bf16 %v881_v37, %v880_v35 }
 0xe96   :  { %678 = vrot.lane.b32.xlu1 %v676_v36, %s1414_s22  ;;  %v891_v36 = vpack.c.bf16 %v883_v33, %v882_v32 }
 0xf08   :  { %v679_v40 = vpop.permute.xlu1 %678 }
 0xf09   :  { %v683_v41 = vadd.f32 %v681_v39, %v679_v40  ;;  %v879_v39 = vld [vmem:[#allocation6 + $0x58] sm:$0xff] }
 0xf0a   :  { %v889_v40 = vpack.c.bf16 %v879_v39, %v878_v60 }
 0xf0b   :  { %1318 = vtanh.f32 %v683_v41  ;;  %v760_v5 = vrot.slane %v683_v41, 2  ;;  %v876_v41 = vld [vmem:[#allocation6 + $0x40] sm:$0xff] }
 0xf18   :  { %v1319_v42 = vpop.eup %1318 }
 0xf19   :  { %685 = vrot.lane.b32.xlu0 %v1319_v42, %s1413_s3  ;;  %v877_v42 = vld [vmem:[#allocation6 + $0x48] sm:$0xff] }
 0xf8b   :  { %v686_v43 = vpop.permute.xlu0 %685 }
 0xf8c   :  { %v688_v44 = vrot.slane %v686_v43, 3  ;;  %v888_v43 = vpack.c.bf16 %v877_v42, %v876_v41 }
 0xf8e   :  { %v690_v45 = vmul.f32 %v688_v44, %v661_v29  ;;  %v874_v44 = vld [vmem:[#allocation6 + $0x30] sm:$0xff] }
 0xf90   :  { %691 = vst [vmem:[#allocation2] sm:$0x20] %v690_v45  ;;  %v692_v46 = vpack.c.bf16 %v690_v45, %v690_v45  ;;  %v875_v45 = vld [vmem:[#allocation6 + $0x38] sm:$0xff] }
 0xf92   :  { %v694_v47 = vshrl.u32 %v692_v46, 16  ;;  %v887_v46 = vpack.c.bf16 %v875_v45, %v874_v44 }
 0xf94   :  { %v696_v48 = vrot.slane %v694_v47, 2 }
 0xf96   :  { %1218 = vmatmul.mubr.bf16.vlgmr.msra.gmra.mxu1 %v696_v48 }
 0xf97   :  { %1257 = vmatprep.mubr.msk.bf16.mxu1 %vm1412_vm1, %v1411_v1  ;;  %1242 = vmatpush3.bf16.msra.mxu1 %v891_v36 }
 0xf98   :  { %1243 = vmatprep.subr.bf16.mxu1 %v1411_v1 }
 0xf9b   :  { %1244 = vmatpush3.bf16.msra.mxu1 %v890_v38 }
 0xf9c   :  { %1245 = vmatprep.subr.bf16.mxu1 %v1411_v1 }
 0xf9f   :  { %1246 = vmatpush3.bf16.msra.mxu1 %v889_v40 }
 0xfa0   :  { %1247 = vmatprep.subr.bf16.mxu1 %v1411_v1 }
 0xfa3   :  { %1248 = vmatpush3.bf16.msra.mxu1 %v888_v43 }
 0xfa4   :  { %1249 = vmatprep.subr.bf16.mxu1 %v1411_v1 }
 0xfa7   :  { %1250 = vmatpush3.bf16.msra.mxu1 %v887_v46 }
 0xfa8   :  { %1251 = vmatprep.subr.bf16.mxu1 %v1411_v1 }
0x1056   :  { %v732_v49 = vpop.f32.mrf.mxu1 }
0x1057   :  { %v739_v50 = vrot.slane %v732_v49, 2 }
0x1058   :  { %v1219_v51 = vpop.f32.mrf.mxu1 }
0x1059   :  { %v741_v53 = vadd.f32 %v739_v50, %v1566_v52 }
0x105a   :  { %v735_v54 = vpop.f32.mrf.mxu1 }
0x105b   :  { %v978_v55 = vmul.f32 -1.442695, %v741_v53  ;;  %v873_v54 = vld [vmem:[#allocation6 + $0x28] sm:$0xff] }
0x105c   :  { %v1220_v56 = vpop.f32.mrf.mxu1 }
0x105d   :  { %1320 = vpow2.f32 %v978_v55  ;;  %v870_v56 = vld [vmem:[#allocation6 + $0x10] sm:$0xff] }
0x105e   :  { %1322 = vtanh.f32 %v741_v53  ;;  %v872_v53 = vld [vmem:[#allocation6 + $0x20] sm:$0xff] }
0x105f   :  { %v886_v55 = vpack.c.bf16 %v873_v54, %v872_v53 }
0x1061   :  { %1252 = vmatpush3.bf16.msra.mxu1 %v886_v55 }
0x1062   :  { %1253 = vmatprep.subr.bf16.mxu1 %v1411_v1 }
0x106a   :  { %v1321_v57 = vpop.eup %1320 }
0x106b   :  { %v746_v58 = vadd.f32 1.0, %v1321_v57  ;;  %v1323_v59 = vpop.eup %1322  ;;  %v871_v57 = vld [vmem:[#allocation6 + $0x18] sm:$0xff] }
0x106d   :  { %1324 = vrcp.f32 %v746_v58  ;;  %v868_v58 = vld [vmem:[#allocation6] sm:$0xff] }
0x107a   :  { %v1325_v61 = vpop.eup %1324 }
0x107b   :  { %v749_v62 = vsel %vm1571_vm7, %v1323_v59, %v1325_v61  ;;  %v885_v59 = vpack.c.bf16 %v871_v57, %v870_v56  ;;  %v869_v61 = vld [vmem:[#allocation6 + $0x8] sm:$0xff] }
0x107c   :  { %v751_v63 = vrot.slane %v749_v62, 6  ;;  %v762_v6 = vmul.f32 %v760_v5, %v749_v62 }
0x107d   :  { %1254 = vmatpush3.bf16.msra.mxu1 %v885_v59 }
0x107e   :  { %753 = vrot.lane.b32.xlu1 %v751_v63, %s1413_s3  ;;  %v769_v7 = vrot.slane %v762_v6, 6  ;;  %1255 = vmatprep.subr.bf16.mxu1 %v1411_v1  ;;  %v980_v6 = vld [vmem:[%s1733_s6] ss:$0 sm:$0xff]  ;;  %s958_s6 = sshll.u32 %s1415_s25, 4  ;;  %s959_s6 = int_to_ptr.vmem [resolvable:$true] %s958_s6 }
0x107f   :  { %s1380_s26 = scalar_lea.vmem %s959_s6, 128  ;;  %p1385_p11 = scmp.lt.s32.totalorder %s959_s6, %s959_s6 }
0x1080   :  { %p1381_p10 = scmp.ne.s32.totalorder %s959_s6, %s1380_s26  ;;  %p1386_p12 = scmp.lt.s32.totalorder %s1380_s26, %s1380_s26 }
0x1082   :  { %p1387_p13 = por %p1386_p12, %p1385_p11 }
0x1084   :  { %p1388_p0 = pnand %p1387_p13, %p1381_p10 }
0x10f0   :  { %v754_v0 = vpop.permute.xlu1 %753 }
0x10f1   :  { %v756_v2 = vrot.slane %v754_v0, 2 }
0x10f3   :  { %v758_v3 = vmul.f32 %v756_v2, %v749_v62 }
0x10f5   :  { %v764_v4 = vrot.slane %v758_v3, 6 }
0x10f7   :  { %766 = vrot.lane.b32.xlu0 %v764_v4, %s1414_s22 }
0x1169   :  { %v767_v8 = vpop.permute.xlu0 %766 }
0x116a   :  { %v771_v10 = vadd.f32 %v769_v7, %v767_v8 }
0x116c   :  { %1326 = vtanh.f32 %v771_v10  ;;  %v846_v47 = vrot.slane %v771_v10, 1 }
0x1179   :  { %v1327_v11 = vpop.eup %1326 }
0x117a   :  { %773 = vrot.lane.b32.xlu1 %v1327_v11, %s1413_s3 }
0x11ec   :  { %v774_v12 = vpop.permute.xlu1 %773 }
0x11ed   :  { %v776_v13 = vrot.slane %v774_v12, 2 }
0x11ef   :  { %v778_v15 = vmul.f32 %v776_v13, %v749_v62  ;;  %v884_v62 = vpack.c.bf16 %v869_v61, %v868_v58 }
0x11f1   :  { %779 = vst [vmem:[#allocation2] sm:$0x40] %v778_v15  ;;  %v780_v16 = vpack.c.bf16 %v778_v15, %v778_v15  ;;  %1256 = vmatpush3.bf16.msra.mxu1 %v884_v62 }
0x11f3   :  { %v782_v18 = vrot.slane %v780_v16, 3 }
0x11f5   :  { %1238 = vmatmul.mubr.bf16.vlgmr.msra.gmra.mxu0 %v782_v18 }
0x12b5   :  { %v818_v19 = vpop.f32.mrf.mxu0 }
0x12b6   :  { %v825_v21 = vrot.slane %v818_v19, 1 }
0x12b7   :  { %v1239_v22 = vpop.f32.mrf.mxu0 }
0x12b8   :  { %v827_v9 = vadd.f32 %v825_v21, %v1566_v52 }
0x12b9   :  { %v821_v14 = vpop.f32.mrf.mxu0 }
0x12ba   :  { %v979_v17 = vmul.f32 -1.442695, %v827_v9 }
0x12bb   :  { %v1240_v20 = vpop.f32.mrf.mxu0 }
0x12bc   :  { %1328 = vpow2.f32 %v979_v17 }
0x12bd   :  { %1330 = vtanh.f32 %v827_v9 }
0x12c9   :  { %v1329_v24 = vpop.eup %1328 }
0x12ca   :  { %v832_v25 = vadd.f32 1.0, %v1329_v24  ;;  %v1331_v23 = vpop.eup %1330 }
0x12cc   :  { %1332 = vrcp.f32 %v832_v25 }
0x12d9   :  { %v1333_v27 = vpop.eup %1332 }
0x12da   :  { %v835_v28 = vsel %vm1571_vm7, %v1331_v23, %v1333_v27 }
0x12db   :  { %v837_v26 = vrot.slane %v835_v28, 7  ;;  %v848_v48 = vmul.f32 %v846_v47, %v835_v28 }
0x12dd   :  { %839 = vrot.lane.b32.xlu0 %v837_v26, %s1413_s3  ;;  %v855_v49 = vrot.slane %v848_v48, 7 }
0x134f   :  { %v840_v30 = vpop.permute.xlu0 %839 }
0x1350   :  { %v842_v29 = vrot.slane %v840_v30, 1 }
0x1352   :  { %v844_v31 = vmul.f32 %v842_v29, %v835_v28 }
0x1354   :  { %v850_v52 = vrot.slane %v844_v31, 7 }
0x1356   :  { %852 = vrot.lane.b32.xlu1 %v850_v52, %s1414_s22 }
0x13c8   :  { %v853_v50 = vpop.permute.xlu1 %852 }
0x13c9   :  { %v857_v51 = vadd.f32 %v855_v49, %v853_v50 }
0x13cb   :  { %1334 = vtanh.f32 %v857_v51 }
0x13d8   :  { %v1335_v63 = vpop.eup %1334 }
0x13d9   :  { %859 = vrot.lane.b32.xlu0 %v1335_v63, %s1413_s3 }
0x144b   :  { %v860_v0 = vpop.permute.xlu0 %859 }
0x144c   :  { %v862_v2 = vrot.slane %v860_v0, 1 }
0x144e   :  { %v864_v3 = vmul.f32 %v862_v2, %v835_v28 }
0x1450   :  { %865 = vst [vmem:[#allocation2] sm:$0x80] %v864_v3 }
0x1457   :  { %v866_v4 = vld [vmem:[#allocation2] sm:$0xff] }
0x1458   :  { %v867_v5 = vpack.c.bf16 %v866_v4, %v866_v4 }
0x145a   :  { %1258 = vmatmul.mubr.bf16.vlgmr.msra.gmra.mxu1 %v867_v5 }
0x151a   :  { %v933_v7 = vpop.f32.mrf.mxu1 }
0x151b   :  { %v934_v8 = vadd.f32 %v980_v6, %v933_v7 }
0x151c   :  { %v1259_v1 = vpop.f32.mrf.mxu1 }
0x151d   :  { %v940_v10 = vsel %vm939_vm8, %v934_v8, -1e+30 }
0x151e   :  { %941 = vmax.xlane.f32.xlu1 %v940_v10  ;;  %v936_v11 = vpop.f32.mrf.mxu1 }
0x1520   :  { %v1260_v12 = vpop.f32.mrf.mxu1 }
0x15a7   :  { %v942_v13 = vpop.xlane.xlu1 %941 }
0x15a8   :  { %v943_v15 = vsub.f32 %v940_v10, %v942_v13 }
0x15aa   :  { %v944_v16 = vmul.f32 1.442695, %v943_v15 }
0x15ac   :  { %1336 = vpow2.f32 %v944_v16 }
0x15b9   :  { %v1337_v18 = vpop.eup %1336 }
0x15ba   :  { %946 = vadd.xlane.f32.xlu0 %v1337_v18 }
0x1643   :  { %v947_v19 = vpop.xlane.xlu0 %946 }
0x1644   :  { %1338 = vlog2.f32 %v947_v19 }
0x1651   :  { %v1339_v21 = vpop.eup %1338 }
0x1652   :  { %v949_v22 = vmul.f32 0.6931472, %v1339_v21 }
0x1654   :  { %v950_v9 = vsub.f32 %v943_v15, %v949_v22 }
0x1656   :  { %951 = vst [vmem:[#allocation8] sm:$0xff] %v950_v9 }
0x1657   :  { %1391 = shalt.err (!%p1388_p0)
}
0x1658   :  { %961 = dma.vmem_to_hbm [thread:$0]  %s959_s6, 128, %s1734_s7, [#allocation5]  }
0x1659   :  { %1404 = dma.done.wait [#allocation5], 128  }
0x165a   :  { %1405 = vsyncadd [#allocation5], 4294967168 }
0x165b   :  { %965 = vsyncpa [#allocation4], 1 }
0x165c   :  { %966 = vsyncpa [#allocation7], 1 }
0x165d   :  { %967 = vsyncpa [#allocation5], 1 }

</bundles_post_ra>
